<compile_context>
chip_gen: v7x
topology: tpu7x:2x2x1
jax: 0.10.0
libtpu: 0.0.40
codegen_flags: <defaults>
</compile_context>

<pallas_src>
import functools

import jax
import jax.numpy as jnp
from jax import lax
from jax.experimental import pallas as pl
from jax.experimental.pallas import tpu as pltpu


def _round_up(x, m):
    return ((x + m - 1) // m) * m


def _make_gather_kernel(tok_block, unroll):
    def gather_kernel(ids_ref, table_ref, out_ref, buf_ref, sem_ref):
        # ids_ref:   (n_pad,)        int32, SMEM (scalar-prefetched)
        # table_ref: (V, D)          HBM ref (memory_space=pl.ANY)
        # out_ref:   (TOK_BLOCK, D)  VMEM output tile
        # buf_ref:   (TOK_BLOCK, D)  VMEM staging buffer (DMA target)
        # sem_ref:   (1,)            DMA semaphore
        base = pl.program_id(0) * tok_block
        sem = sem_ref.at[0]

        def issue(t, carry):
            row = ids_ref[base + t]
            pltpu.make_async_copy(table_ref.at[row], buf_ref.at[t], sem).start()
            return carry

        lax.fori_loop(0, tok_block, issue, 0, unroll=unroll)

        def drain(t, carry):
            # Same-shaped descriptor; waits for one row-sized completion.
            pltpu.make_async_copy(table_ref.at[0], buf_ref.at[0], sem).wait()
            return carry

        lax.fori_loop(0, tok_block, drain, 0, unroll=unroll)

        # Single lane-dense store of the whole gathered slab.
        out_ref[...] = buf_ref[...]

    return gather_kernel


@functools.partial(jax.jit, static_argnames=("tok_block",))
def remote_embedding_forward(indices, table, *, tok_block=256):
    """Equivalent of RemoteEmbedding.forward: table[indices] (OOB clamped)."""
    b, s = indices.shape
    v, d = table.shape
    n = b * s

    # Block size: multiple of 8 sublanes, capped so the grid has >= 2 steps
    # when the token count allows (keeps both v7x TensorCores busy), and never
    # larger than requested.
    tok_block = max(8, (tok_block // 8) * 8)
    tb = min(tok_block, _round_up(-(-n // 2), 8))
    tb = max(8, tb)
    n_pad = _round_up(n, tb)
    grid = (n_pad // tb,)

    # Clamp (jnp.take semantics) and pad with row 0 (valid; sliced off below).
    ids = jnp.clip(indices.reshape(n).astype(jnp.int32), 0, v - 1)
    ids = jnp.pad(ids, (0, n_pad - n))

    kernel = _make_gather_kernel(tb, unroll=(tb <= 64))

    itemsize = jnp.dtype(table.dtype).itemsize
    bytes_accessed = 2 * n_pad * d * itemsize + n_pad * 4  # rows read+written, ids

    out_flat = pl.pallas_call(
        kernel,
        out_shape=jax.ShapeDtypeStruct((n_pad, d), table.dtype),
        grid_spec=pltpu.PrefetchScalarGridSpec(
            num_scalar_prefetch=1,                     # ids -> SMEM
            grid=grid,
            in_specs=[pl.BlockSpec(memory_space=pl.ANY)],   # table stays in HBM
            out_specs=pl.BlockSpec((tb, d), lambda i, ids: (i, 0)),
            scratch_shapes=[
                pltpu.VMEM((tb, d), table.dtype),      # staging buffer
                pltpu.SemaphoreType.DMA((1,)),         # shared DMA semaphore
            ],
        ),
        compiler_params=pltpu.CompilerParams(
            dimension_semantics=("parallel",),
            vmem_limit_bytes=32 * 1024 * 1024,
        ),
        cost_estimate=pl.CostEstimate(
            flops=0, transcendentals=0, bytes_accessed=bytes_accessed
        ),
    )(ids, table)

    return out_flat[:n].reshape(b, s, d)


if __name__ == "__main__":
    NUM_EMBEDDINGS = 1000
    EMBEDDING_DIM = 128
    BATCH = 2
    SEQ = 8

    key = jax.random.PRNGKey(0)
    k_table, k_ids = jax.random.split(key)

    # nn.Embedding default init: weight ~ N(0, 1)
    table = jax.random.normal(
        k_table, (NUM_EMBEDDINGS, EMBEDDING_DIM), dtype=jnp.float32
    )
    indices = jax.random.randint(
        k_ids, (BATCH, SEQ), 0, NUM_EMBEDDINGS, dtype=jnp.int32
    )

    out = remote_embedding_forward(indices, table)
    out = jax.block_until_ready(out)

    # Reference check against plain JAX gather.
    ref = jnp.take(table, indices, axis=0)
    assert out.shape == (BATCH, SEQ, EMBEDDING_DIM)
    assert jnp.allclose(out, ref, atol=1e-6, rtol=1e-6)

    print("KERNEL_OK")
</pallas_src>

<mosaic_0001>
module attributes {stable_mosaic.version = 11 : i64} {
  func.func @gather_kernel(%arg0: i32, %arg1: memref<16xi32, #tpu.memory_space<smem>>, %arg2: memref<1000x128xf32, #tpu.memory_space<any>>, %arg3: memref<8x128xf32, #tpu.memory_space<vmem>>, %arg4: memref<8x128xf32, #tpu.memory_space<vmem>>, %arg5: memref<1x!tpu.dma_semaphore, #tpu.memory_space<semaphore_mem>>) attributes {dimension_semantics = [#tpu.dimension_semantics<parallel>], iteration_bounds = array<i64: 2>, scalar_prefetch = 1 : i64, scratch_operands = 2 : i64, tpu.core_type = #tpu.core_type<tc>, window_params = [{}, {transform_indices = @transform_1, window_bounds = array<i64: 8, 128>}]} {
    %c8_i32 = arith.constant 8 : i32
    %0 = arith.muli %arg0, %c8_i32 : i32
    %c0_i32 = arith.constant 0 : i32
    %c0_i32_0 = arith.constant 0 : i32
    %1 = arith.addi %0, %c0_i32_0 : i32
    %2 = arith.index_cast %1 : i32 to index
    %3 = memref.load %arg1[%2] : memref<16xi32, #tpu.memory_space<smem>>
    %c0_i32_1 = arith.constant 0 : i32
    %4 = tpu.memref_slice %arg2[%3, %c0_i32_1] : memref<1000x128xf32, #tpu.memory_space<any>> -> memref<1x128xf32, #tpu.memory_space<any>>
    %5 = tpu.memref_squeeze %4 : memref<1x128xf32, #tpu.memory_space<any>> -> memref<128xf32, #tpu.memory_space<any>>
    %c0_i32_2 = arith.constant 0 : i32
    %6 = tpu.memref_slice %arg4[%c0_i32_0, %c0_i32_2] : memref<8x128xf32, #tpu.memory_space<vmem>> -> memref<1x128xf32, #tpu.memory_space<vmem>>
    %7 = tpu.memref_squeeze %6 : memref<1x128xf32, #tpu.memory_space<vmem>> -> memref<128xf32, #tpu.memory_space<vmem>>
    %8 = tpu.memref_slice %arg5[%c0_i32] : memref<1x!tpu.dma_semaphore, #tpu.memory_space<semaphore_mem>> -> memref<1x!tpu.dma_semaphore, #tpu.memory_space<semaphore_mem>>
    %9 = tpu.memref_squeeze %8 : memref<1x!tpu.dma_semaphore, #tpu.memory_space<semaphore_mem>> -> memref<!tpu.dma_semaphore, #tpu.memory_space<semaphore_mem>>
    tpu.enqueue_dma source(%5 : memref<128xf32, #tpu.memory_space<any>>) target(%7 : memref<128xf32, #tpu.memory_space<vmem>>) target_semaphore(%9 : memref<!tpu.dma_semaphore, #tpu.memory_space<semaphore_mem>>)
    %c1_i32 = arith.constant 1 : i32
    %10 = arith.addi %0, %c1_i32 : i32
    %11 = arith.index_cast %10 : i32 to index
    %12 = memref.load %arg1[%11] : memref<16xi32, #tpu.memory_space<smem>>
    %c0_i32_3 = arith.constant 0 : i32
    %13 = tpu.memref_slice %arg2[%12, %c0_i32_3] : memref<1000x128xf32, #tpu.memory_space<any>> -> memref<1x128xf32, #tpu.memory_space<any>>
    %14 = tpu.memref_squeeze %13 : memref<1x128xf32, #tpu.memory_space<any>> -> memref<128xf32, #tpu.memory_space<any>>
    %c0_i32_4 = arith.constant 0 : i32
    %15 = tpu.memref_slice %arg4[%c1_i32, %c0_i32_4] : memref<8x128xf32, #tpu.memory_space<vmem>> -> memref<1x128xf32, #tpu.memory_space<vmem>>
    %16 = tpu.memref_squeeze %15 : memref<1x128xf32, #tpu.memory_space<vmem>> -> memref<128xf32, #tpu.memory_space<vmem>>
    %17 = tpu.memref_slice %arg5[%c0_i32] : memref<1x!tpu.dma_semaphore, #tpu.memory_space<semaphore_mem>> -> memref<1x!tpu.dma_semaphore, #tpu.memory_space<semaphore_mem>>
    %18 = tpu.memref_squeeze %17 : memref<1x!tpu.dma_semaphore, #tpu.memory_space<semaphore_mem>> -> memref<!tpu.dma_semaphore, #tpu.memory_space<semaphore_mem>>
    tpu.enqueue_dma source(%14 : memref<128xf32, #tpu.memory_space<any>>) target(%16 : memref<128xf32, #tpu.memory_space<vmem>>) target_semaphore(%18 : memref<!tpu.dma_semaphore, #tpu.memory_space<semaphore_mem>>)
    %c2_i32 = arith.constant 2 : i32
    %19 = arith.addi %0, %c2_i32 : i32
    %20 = arith.index_cast %19 : i32 to index
    %21 = memref.load %arg1[%20] : memref<16xi32, #tpu.memory_space<smem>>
    %c0_i32_5 = arith.constant 0 : i32
    %22 = tpu.memref_slice %arg2[%21, %c0_i32_5] : memref<1000x128xf32, #tpu.memory_space<any>> -> memref<1x128xf32, #tpu.memory_space<any>>
    %23 = tpu.memref_squeeze %22 : memref<1x128xf32, #tpu.memory_space<any>> -> memref<128xf32, #tpu.memory_space<any>>
    %c0_i32_6 = arith.constant 0 : i32
    %24 = tpu.memref_slice %arg4[%c2_i32, %c0_i32_6] : memref<8x128xf32, #tpu.memory_space<vmem>> -> memref<1x128xf32, #tpu.memory_space<vmem>>
    %25 = tpu.memref_squeeze %24 : memref<1x128xf32, #tpu.memory_space<vmem>> -> memref<128xf32, #tpu.memory_space<vmem>>
    %26 = tpu.memref_slice %arg5[%c0_i32] : memref<1x!tpu.dma_semaphore, #tpu.memory_space<semaphore_mem>> -> memref<1x!tpu.dma_semaphore, #tpu.memory_space<semaphore_mem>>
    %27 = tpu.memref_squeeze %26 : memref<1x!tpu.dma_semaphore, #tpu.memory_space<semaphore_mem>> -> memref<!tpu.dma_semaphore, #tpu.memory_space<semaphore_mem>>
    tpu.enqueue_dma source(%23 : memref<128xf32, #tpu.memory_space<any>>) target(%25 : memref<128xf32, #tpu.memory_space<vmem>>) target_semaphore(%27 : memref<!tpu.dma_semaphore, #tpu.memory_space<semaphore_mem>>)
    %c3_i32 = arith.constant 3 : i32
    %28 = arith.addi %0, %c3_i32 : i32
    %29 = arith.index_cast %28 : i32 to index
    %30 = memref.load %arg1[%29] : memref<16xi32, #tpu.memory_space<smem>>
    %c0_i32_7 = arith.constant 0 : i32
    %31 = tpu.memref_slice %arg2[%30, %c0_i32_7] : memref<1000x128xf32, #tpu.memory_space<any>> -> memref<1x128xf32, #tpu.memory_space<any>>
    %32 = tpu.memref_squeeze %31 : memref<1x128xf32, #tpu.memory_space<any>> -> memref<128xf32, #tpu.memory_space<any>>
    %c0_i32_8 = arith.constant 0 : i32
    %33 = tpu.memref_slice %arg4[%c3_i32, %c0_i32_8] : memref<8x128xf32, #tpu.memory_space<vmem>> -> memref<1x128xf32, #tpu.memory_space<vmem>>
    %34 = tpu.memref_squeeze %33 : memref<1x128xf32, #tpu.memory_space<vmem>> -> memref<128xf32, #tpu.memory_space<vmem>>
    %35 = tpu.memref_slice %arg5[%c0_i32] : memref<1x!tpu.dma_semaphore, #tpu.memory_space<semaphore_mem>> -> memref<1x!tpu.dma_semaphore, #tpu.memory_space<semaphore_mem>>
    %36 = tpu.memref_squeeze %35 : memref<1x!tpu.dma_semaphore, #tpu.memory_space<semaphore_mem>> -> memref<!tpu.dma_semaphore, #tpu.memory_space<semaphore_mem>>
    tpu.enqueue_dma source(%32 : memref<128xf32, #tpu.memory_space<any>>) target(%34 : memref<128xf32, #tpu.memory_space<vmem>>) target_semaphore(%36 : memref<!tpu.dma_semaphore, #tpu.memory_space<semaphore_mem>>)
    %c4_i32 = arith.constant 4 : i32
    %37 = arith.addi %0, %c4_i32 : i32
    %38 = arith.index_cast %37 : i32 to index
    %39 = memref.load %arg1[%38] : memref<16xi32, #tpu.memory_space<smem>>
    %c0_i32_9 = arith.constant 0 : i32
    %40 = tpu.memref_slice %arg2[%39, %c0_i32_9] : memref<1000x128xf32, #tpu.memory_space<any>> -> memref<1x128xf32, #tpu.memory_space<any>>
    %41 = tpu.memref_squeeze %40 : memref<1x128xf32, #tpu.memory_space<any>> -> memref<128xf32, #tpu.memory_space<any>>
    %c0_i32_10 = arith.constant 0 : i32
    %42 = tpu.memref_slice %arg4[%c4_i32, %c0_i32_10] : memref<8x128xf32, #tpu.memory_space<vmem>> -> memref<1x128xf32, #tpu.memory_space<vmem>>
    %43 = tpu.memref_squeeze %42 : memref<1x128xf32, #tpu.memory_space<vmem>> -> memref<128xf32, #tpu.memory_space<vmem>>
    %44 = tpu.memref_slice %arg5[%c0_i32] : memref<1x!tpu.dma_semaphore, #tpu.memory_space<semaphore_mem>> -> memref<1x!tpu.dma_semaphore, #tpu.memory_space<semaphore_mem>>
    %45 = tpu.memref_squeeze %44 : memref<1x!tpu.dma_semaphore, #tpu.memory_space<semaphore_mem>> -> memref<!tpu.dma_semaphore, #tpu.memory_space<semaphore_mem>>
    tpu.enqueue_dma source(%41 : memref<128xf32, #tpu.memory_space<any>>) target(%43 : memref<128xf32, #tpu.memory_space<vmem>>) target_semaphore(%45 : memref<!tpu.dma_semaphore, #tpu.memory_space<semaphore_mem>>)
    %c5_i32 = arith.constant 5 : i32
    %46 = arith.addi %0, %c5_i32 : i32
    %47 = arith.index_cast %46 : i32 to index
    %48 = memref.load %arg1[%47] : memref<16xi32, #tpu.memory_space<smem>>
    %c0_i32_11 = arith.constant 0 : i32
    %49 = tpu.memref_slice %arg2[%48, %c0_i32_11] : memref<1000x128xf32, #tpu.memory_space<any>> -> memref<1x128xf32, #tpu.memory_space<any>>
    %50 = tpu.memref_squeeze %49 : memref<1x128xf32, #tpu.memory_space<any>> -> memref<128xf32, #tpu.memory_space<any>>
    %c0_i32_12 = arith.constant 0 : i32
    %51 = tpu.memref_slice %arg4[%c5_i32, %c0_i32_12] : memref<8x128xf32, #tpu.memory_space<vmem>> -> memref<1x128xf32, #tpu.memory_space<vmem>>
    %52 = tpu.memref_squeeze %51 : memref<1x128xf32, #tpu.memory_space<vmem>> -> memref<128xf32, #tpu.memory_space<vmem>>
    %53 = tpu.memref_slice %arg5[%c0_i32] : memref<1x!tpu.dma_semaphore, #tpu.memory_space<semaphore_mem>> -> memref<1x!tpu.dma_semaphore, #tpu.memory_space<semaphore_mem>>
    %54 = tpu.memref_squeeze %53 : memref<1x!tpu.dma_semaphore, #tpu.memory_space<semaphore_mem>> -> memref<!tpu.dma_semaphore, #tpu.memory_space<semaphore_mem>>
    tpu.enqueue_dma source(%50 : memref<128xf32, #tpu.memory_space<any>>) target(%52 : memref<128xf32, #tpu.memory_space<vmem>>) target_semaphore(%54 : memref<!tpu.dma_semaphore, #tpu.memory_space<semaphore_mem>>)
    %c6_i32 = arith.constant 6 : i32
    %55 = arith.addi %0, %c6_i32 : i32
    %56 = arith.index_cast %55 : i32 to index
    %57 = memref.load %arg1[%56] : memref<16xi32, #tpu.memory_space<smem>>
    %c0_i32_13 = arith.constant 0 : i32
    %58 = tpu.memref_slice %arg2[%57, %c0_i32_13] : memref<1000x128xf32, #tpu.memory_space<any>> -> memref<1x128xf32, #tpu.memory_space<any>>
    %59 = tpu.memref_squeeze %58 : memref<1x128xf32, #tpu.memory_space<any>> -> memref<128xf32, #tpu.memory_space<any>>
    %c0_i32_14 = arith.constant 0 : i32
    %60 = tpu.memref_slice %arg4[%c6_i32, %c0_i32_14] : memref<8x128xf32, #tpu.memory_space<vmem>> -> memref<1x128xf32, #tpu.memory_space<vmem>>
    %61 = tpu.memref_squeeze %60 : memref<1x128xf32, #tpu.memory_space<vmem>> -> memref<128xf32, #tpu.memory_space<vmem>>
    %62 = tpu.memref_slice %arg5[%c0_i32] : memref<1x!tpu.dma_semaphore, #tpu.memory_space<semaphore_mem>> -> memref<1x!tpu.dma_semaphore, #tpu.memory_space<semaphore_mem>>
    %63 = tpu.memref_squeeze %62 : memref<1x!tpu.dma_semaphore, #tpu.memory_space<semaphore_mem>> -> memref<!tpu.dma_semaphore, #tpu.memory_space<semaphore_mem>>
    tpu.enqueue_dma source(%59 : memref<128xf32, #tpu.memory_space<any>>) target(%61 : memref<128xf32, #tpu.memory_space<vmem>>) target_semaphore(%63 : memref<!tpu.dma_semaphore, #tpu.memory_space<semaphore_mem>>)
    %c7_i32 = arith.constant 7 : i32
    %64 = arith.addi %0, %c7_i32 : i32
    %65 = arith.index_cast %64 : i32 to index
    %66 = memref.load %arg1[%65] : memref<16xi32, #tpu.memory_space<smem>>
    %c0_i32_15 = arith.constant 0 : i32
    %67 = tpu.memref_slice %arg2[%66, %c0_i32_15] : memref<1000x128xf32, #tpu.memory_space<any>> -> memref<1x128xf32, #tpu.memory_space<any>>
    %68 = tpu.memref_squeeze %67 : memref<1x128xf32, #tpu.memory_space<any>> -> memref<128xf32, #tpu.memory_space<any>>
    %c0_i32_16 = arith.constant 0 : i32
    %69 = tpu.memref_slice %arg4[%c7_i32, %c0_i32_16] : memref<8x128xf32, #tpu.memory_space<vmem>> -> memref<1x128xf32, #tpu.memory_space<vmem>>
    %70 = tpu.memref_squeeze %69 : memref<1x128xf32, #tpu.memory_space<vmem>> -> memref<128xf32, #tpu.memory_space<vmem>>
    %71 = tpu.memref_slice %arg5[%c0_i32] : memref<1x!tpu.dma_semaphore, #tpu.memory_space<semaphore_mem>> -> memref<1x!tpu.dma_semaphore, #tpu.memory_space<semaphore_mem>>
    %72 = tpu.memref_squeeze %71 : memref<1x!tpu.dma_semaphore, #tpu.memory_space<semaphore_mem>> -> memref<!tpu.dma_semaphore, #tpu.memory_space<semaphore_mem>>
    tpu.enqueue_dma source(%68 : memref<128xf32, #tpu.memory_space<any>>) target(%70 : memref<128xf32, #tpu.memory_space<vmem>>) target_semaphore(%72 : memref<!tpu.dma_semaphore, #tpu.memory_space<semaphore_mem>>)
    %c8_i32_17 = arith.constant 8 : i32
    %c0_i32_18 = arith.constant 0 : i32
    %c0_i32_19 = arith.constant 0 : i32
    %c0_i32_20 = arith.constant 0 : i32
    %c0_i32_21 = arith.constant 0 : i32
    %c0_i32_22 = arith.constant 0 : i32
    %73 = tpu.memref_slice %arg2[%c0_i32_20, %c0_i32_22] : memref<1000x128xf32, #tpu.memory_space<any>> -> memref<1x128xf32, #tpu.memory_space<any>>
    %74 = tpu.memref_squeeze %73 : memref<1x128xf32, #tpu.memory_space<any>> -> memref<128xf32, #tpu.memory_space<any>>
    %c0_i32_23 = arith.constant 0 : i32
    %75 = tpu.memref_slice %arg4[%c0_i32_21, %c0_i32_23] : memref<8x128xf32, #tpu.memory_space<vmem>> -> memref<1x128xf32, #tpu.memory_space<vmem>>
    %76 = tpu.memref_squeeze %75 : memref<1x128xf32, #tpu.memory_space<vmem>> -> memref<128xf32, #tpu.memory_space<vmem>>
    %77 = tpu.memref_slice %arg5[%c0_i32_18] : memref<1x!tpu.dma_semaphore, #tpu.memory_space<semaphore_mem>> -> memref<1x!tpu.dma_semaphore, #tpu.memory_space<semaphore_mem>>
    %78 = tpu.memref_squeeze %77 : memref<1x!tpu.dma_semaphore, #tpu.memory_space<semaphore_mem>> -> memref<!tpu.dma_semaphore, #tpu.memory_space<semaphore_mem>>
    tpu.wait_dma2 semaphore(%78 : memref<!tpu.dma_semaphore, #tpu.memory_space<semaphore_mem>>) src(%74 : memref<128xf32, #tpu.memory_space<any>>) dst(%76 : memref<128xf32, #tpu.memory_space<vmem>>)
    %c1_i32_24 = arith.constant 1 : i32
    %c0_i32_25 = arith.constant 0 : i32
    %c0_i32_26 = arith.constant 0 : i32
    %c0_i32_27 = arith.constant 0 : i32
    %79 = tpu.memref_slice %arg2[%c0_i32_25, %c0_i32_27] : memref<1000x128xf32, #tpu.memory_space<any>> -> memref<1x128xf32, #tpu.memory_space<any>>
    %80 = tpu.memref_squeeze %79 : memref<1x128xf32, #tpu.memory_space<any>> -> memref<128xf32, #tpu.memory_space<any>>
    %c0_i32_28 = arith.constant 0 : i32
    %81 = tpu.memref_slice %arg4[%c0_i32_26, %c0_i32_28] : memref<8x128xf32, #tpu.memory_space<vmem>> -> memref<1x128xf32, #tpu.memory_space<vmem>>
    %82 = tpu.memref_squeeze %81 : memref<1x128xf32, #tpu.memory_space<vmem>> -> memref<128xf32, #tpu.memory_space<vmem>>
    %83 = tpu.memref_slice %arg5[%c0_i32_18] : memref<1x!tpu.dma_semaphore, #tpu.memory_space<semaphore_mem>> -> memref<1x!tpu.dma_semaphore, #tpu.memory_space<semaphore_mem>>
    %84 = tpu.memref_squeeze %83 : memref<1x!tpu.dma_semaphore, #tpu.memory_space<semaphore_mem>> -> memref<!tpu.dma_semaphore, #tpu.memory_space<semaphore_mem>>
    tpu.wait_dma2 semaphore(%84 : memref<!tpu.dma_semaphore, #tpu.memory_space<semaphore_mem>>) src(%80 : memref<128xf32, #tpu.memory_space<any>>) dst(%82 : memref<128xf32, #tpu.memory_space<vmem>>)
    %c2_i32_29 = arith.constant 2 : i32
    %c0_i32_30 = arith.constant 0 : i32
    %c0_i32_31 = arith.constant 0 : i32
    %c0_i32_32 = arith.constant 0 : i32
    %85 = tpu.memref_slice %arg2[%c0_i32_30, %c0_i32_32] : memref<1000x128xf32, #tpu.memory_space<any>> -> memref<1x128xf32, #tpu.memory_space<any>>
    %86 = tpu.memref_squeeze %85 : memref<1x128xf32, #tpu.memory_space<any>> -> memref<128xf32, #tpu.memory_space<any>>
    %c0_i32_33 = arith.constant 0 : i32
    %87 = tpu.memref_slice %arg4[%c0_i32_31, %c0_i32_33] : memref<8x128xf32, #tpu.memory_space<vmem>> -> memref<1x128xf32, #tpu.memory_space<vmem>>
    %88 = tpu.memref_squeeze %87 : memref<1x128xf32, #tpu.memory_space<vmem>> -> memref<128xf32, #tpu.memory_space<vmem>>
    %89 = tpu.memref_slice %arg5[%c0_i32_18] : memref<1x!tpu.dma_semaphore, #tpu.memory_space<semaphore_mem>> -> memref<1x!tpu.dma_semaphore, #tpu.memory_space<semaphore_mem>>
    %90 = tpu.memref_squeeze %89 : memref<1x!tpu.dma_semaphore, #tpu.memory_space<semaphore_mem>> -> memref<!tpu.dma_semaphore, #tpu.memory_space<semaphore_mem>>
    tpu.wait_dma2 semaphore(%90 : memref<!tpu.dma_semaphore, #tpu.memory_space<semaphore_mem>>) src(%86 : memref<128xf32, #tpu.memory_space<any>>) dst(%88 : memref<128xf32, #tpu.memory_space<vmem>>)
    %c3_i32_34 = arith.constant 3 : i32
    %c0_i32_35 = arith.constant 0 : i32
    %c0_i32_36 = arith.constant 0 : i32
    %c0_i32_37 = arith.constant 0 : i32
    %91 = tpu.memref_slice %arg2[%c0_i32_35, %c0_i32_37] : memref<1000x128xf32, #tpu.memory_space<any>> -> memref<1x128xf32, #tpu.memory_space<any>>
    %92 = tpu.memref_squeeze %91 : memref<1x128xf32, #tpu.memory_space<any>> -> memref<128xf32, #tpu.memory_space<any>>
    %c0_i32_38 = arith.constant 0 : i32
    %93 = tpu.memref_slice %arg4[%c0_i32_36, %c0_i32_38] : memref<8x128xf32, #tpu.memory_space<vmem>> -> memref<1x128xf32, #tpu.memory_space<vmem>>
    %94 = tpu.memref_squeeze %93 : memref<1x128xf32, #tpu.memory_space<vmem>> -> memref<128xf32, #tpu.memory_space<vmem>>
    %95 = tpu.memref_slice %arg5[%c0_i32_18] : memref<1x!tpu.dma_semaphore, #tpu.memory_space<semaphore_mem>> -> memref<1x!tpu.dma_semaphore, #tpu.memory_space<semaphore_mem>>
    %96 = tpu.memref_squeeze %95 : memref<1x!tpu.dma_semaphore, #tpu.memory_space<semaphore_mem>> -> memref<!tpu.dma_semaphore, #tpu.memory_space<semaphore_mem>>
    tpu.wait_dma2 semaphore(%96 : memref<!tpu.dma_semaphore, #tpu.memory_space<semaphore_mem>>) src(%92 : memref<128xf32, #tpu.memory_space<any>>) dst(%94 : memref<128xf32, #tpu.memory_space<vmem>>)
    %c4_i32_39 = arith.constant 4 : i32
    %c0_i32_40 = arith.constant 0 : i32
    %c0_i32_41 = arith.constant 0 : i32
    %c0_i32_42 = arith.constant 0 : i32
    %97 = tpu.memref_slice %arg2[%c0_i32_40, %c0_i32_42] : memref<1000x128xf32, #tpu.memory_space<any>> -> memref<1x128xf32, #tpu.memory_space<any>>
    %98 = tpu.memref_squeeze %97 : memref<1x128xf32, #tpu.memory_space<any>> -> memref<128xf32, #tpu.memory_space<any>>
    %c0_i32_43 = arith.constant 0 : i32
    %99 = tpu.memref_slice %arg4[%c0_i32_41, %c0_i32_43] : memref<8x128xf32, #tpu.memory_space<vmem>> -> memref<1x128xf32, #tpu.memory_space<vmem>>
    %100 = tpu.memref_squeeze %99 : memref<1x128xf32, #tpu.memory_space<vmem>> -> memref<128xf32, #tpu.memory_space<vmem>>
    %101 = tpu.memref_slice %arg5[%c0_i32_18] : memref<1x!tpu.dma_semaphore, #tpu.memory_space<semaphore_mem>> -> memref<1x!tpu.dma_semaphore, #tpu.memory_space<semaphore_mem>>
    %102 = tpu.memref_squeeze %101 : memref<1x!tpu.dma_semaphore, #tpu.memory_space<semaphore_mem>> -> memref<!tpu.dma_semaphore, #tpu.memory_space<semaphore_mem>>
    tpu.wait_dma2 semaphore(%102 : memref<!tpu.dma_semaphore, #tpu.memory_space<semaphore_mem>>) src(%98 : memref<128xf32, #tpu.memory_space<any>>) dst(%100 : memref<128xf32, #tpu.memory_space<vmem>>)
    %c5_i32_44 = arith.constant 5 : i32
    %c0_i32_45 = arith.constant 0 : i32
    %c0_i32_46 = arith.constant 0 : i32
    %c0_i32_47 = arith.constant 0 : i32
    %103 = tpu.memref_slice %arg2[%c0_i32_45, %c0_i32_47] : memref<1000x128xf32, #tpu.memory_space<any>> -> memref<1x128xf32, #tpu.memory_space<any>>
    %104 = tpu.memref_squeeze %103 : memref<1x128xf32, #tpu.memory_space<any>> -> memref<128xf32, #tpu.memory_space<any>>
    %c0_i32_48 = arith.constant 0 : i32
    %105 = tpu.memref_slice %arg4[%c0_i32_46, %c0_i32_48] : memref<8x128xf32, #tpu.memory_space<vmem>> -> memref<1x128xf32, #tpu.memory_space<vmem>>
    %106 = tpu.memref_squeeze %105 : memref<1x128xf32, #tpu.memory_space<vmem>> -> memref<128xf32, #tpu.memory_space<vmem>>
    %107 = tpu.memref_slice %arg5[%c0_i32_18] : memref<1x!tpu.dma_semaphore, #tpu.memory_space<semaphore_mem>> -> memref<1x!tpu.dma_semaphore, #tpu.memory_space<semaphore_mem>>
    %108 = tpu.memref_squeeze %107 : memref<1x!tpu.dma_semaphore, #tpu.memory_space<semaphore_mem>> -> memref<!tpu.dma_semaphore, #tpu.memory_space<semaphore_mem>>
    tpu.wait_dma2 semaphore(%108 : memref<!tpu.dma_semaphore, #tpu.memory_space<semaphore_mem>>) src(%104 : memref<128xf32, #tpu.memory_space<any>>) dst(%106 : memref<128xf32, #tpu.memory_space<vmem>>)
    %c6_i32_49 = arith.constant 6 : i32
    %c0_i32_50 = arith.constant 0 : i32
    %c0_i32_51 = arith.constant 0 : i32
    %c0_i32_52 = arith.constant 0 : i32
    %109 = tpu.memref_slice %arg2[%c0_i32_50, %c0_i32_52] : memref<1000x128xf32, #tpu.memory_space<any>> -> memref<1x128xf32, #tpu.memory_space<any>>
    %110 = tpu.memref_squeeze %109 : memref<1x128xf32, #tpu.memory_space<any>> -> memref<128xf32, #tpu.memory_space<any>>
    %c0_i32_53 = arith.constant 0 : i32
    %111 = tpu.memref_slice %arg4[%c0_i32_51, %c0_i32_53] : memref<8x128xf32, #tpu.memory_space<vmem>> -> memref<1x128xf32, #tpu.memory_space<vmem>>
    %112 = tpu.memref_squeeze %111 : memref<1x128xf32, #tpu.memory_space<vmem>> -> memref<128xf32, #tpu.memory_space<vmem>>
    %113 = tpu.memref_slice %arg5[%c0_i32_18] : memref<1x!tpu.dma_semaphore, #tpu.memory_space<semaphore_mem>> -> memref<1x!tpu.dma_semaphore, #tpu.memory_space<semaphore_mem>>
    %114 = tpu.memref_squeeze %113 : memref<1x!tpu.dma_semaphore, #tpu.memory_space<semaphore_mem>> -> memref<!tpu.dma_semaphore, #tpu.memory_space<semaphore_mem>>
    tpu.wait_dma2 semaphore(%114 : memref<!tpu.dma_semaphore, #tpu.memory_space<semaphore_mem>>) src(%110 : memref<128xf32, #tpu.memory_space<any>>) dst(%112 : memref<128xf32, #tpu.memory_space<vmem>>)
    %c7_i32_54 = arith.constant 7 : i32
    %c0_i32_55 = arith.constant 0 : i32
    %c0_i32_56 = arith.constant 0 : i32
    %c0_i32_57 = arith.constant 0 : i32
    %115 = tpu.memref_slice %arg2[%c0_i32_55, %c0_i32_57] : memref<1000x128xf32, #tpu.memory_space<any>> -> memref<1x128xf32, #tpu.memory_space<any>>
    %116 = tpu.memref_squeeze %115 : memref<1x128xf32, #tpu.memory_space<any>> -> memref<128xf32, #tpu.memory_space<any>>
    %c0_i32_58 = arith.constant 0 : i32
    %117 = tpu.memref_slice %arg4[%c0_i32_56, %c0_i32_58] : memref<8x128xf32, #tpu.memory_space<vmem>> -> memref<1x128xf32, #tpu.memory_space<vmem>>
    %118 = tpu.memref_squeeze %117 : memref<1x128xf32, #tpu.memory_space<vmem>> -> memref<128xf32, #tpu.memory_space<vmem>>
    %119 = tpu.memref_slice %arg5[%c0_i32_18] : memref<1x!tpu.dma_semaphore, #tpu.memory_space<semaphore_mem>> -> memref<1x!tpu.dma_semaphore, #tpu.memory_space<semaphore_mem>>
    %120 = tpu.memref_squeeze %119 : memref<1x!tpu.dma_semaphore, #tpu.memory_space<semaphore_mem>> -> memref<!tpu.dma_semaphore, #tpu.memory_space<semaphore_mem>>
    tpu.wait_dma2 semaphore(%120 : memref<!tpu.dma_semaphore, #tpu.memory_space<semaphore_mem>>) src(%116 : memref<128xf32, #tpu.memory_space<any>>) dst(%118 : memref<128xf32, #tpu.memory_space<vmem>>)
    %c0 = arith.constant 0 : index
    %c0_59 = arith.constant 0 : index
    %121 = vector.load %arg4[%c0, %c0_59] : memref<8x128xf32, #tpu.memory_space<vmem>>, vector<8x128xf32>
    %c0_60 = arith.constant 0 : index
    %c0_61 = arith.constant 0 : index
    %122 = vector.load %arg3[%c0_60, %c0_61] : memref<8x128xf32, #tpu.memory_space<vmem>>, vector<8x128xf32>
    tpu.vector_store %arg3[%c0_60, %c0_61], %121 {strides = array<i32>} : memref<8x128xf32, #tpu.memory_space<vmem>>, vector<8x128xf32>,
    return
  }
  func.func @transform_1(%arg0: i32, %arg1: memref<16xi32, #tpu.memory_space<smem>>) -> (i32, i32) {
    %c0_i32 = arith.constant 0 : i32
    %c0_i32_0 = arith.constant 0 : i32
    return %arg0, %c0_i32 : i32, i32
  }
}

</mosaic_0001>

<bundles_post_ra>
// kernel: remote_embedding_forward.1
= control target key start
LH: loop header
LB: loop body
LE: loop exit
PB: predicated region body
PF: predicated region fallthrough
CT: control target
= control target key end

     0   :  { %s843_s0 = inlined_call_operand.vmem [shape: s32[16], index: 0, kind: input, shape index: {}]   ;;  %s844_s1 = inlined_call_operand.hbm [shape: f32[1000,128], index: 1, kind: input, shape index: {}]   ;;  %s845_s2 = inlined_call_operand.hbm [shape: f32[16,128], index: 2, kind: output, shape index: {}]  }
   0x1   :  { %s7_s11 = sshll.u32 %s843_s0, 4  ;;  %s8_s11 = int_to_ptr.vmem [resolvable:$true] %s7_s11 }
   0x2   :  { %s336_s12 = scalar_lea.vmem %s8_s11, 16  ;;  %p341_p1 = scmp.lt.s32.totalorder %s8_s11, %s8_s11 }
   0x3   :  { %p337_p0 = scmp.ne.s32.totalorder %s8_s11, %s336_s12  ;;  %p342_p2 = scmp.lt.s32.totalorder %s336_s12, %s336_s12 }
   0x5   :  { %p343_p3 = por %p342_p2, %p341_p1 }
   0x7   :  { %p344_p4 = pnand %p343_p3, %p337_p0 }
   0x9   :  { %347 = shalt.err (!%p344_p4)  }
   0xa   :  { %s600_s13 = smov [#allocation5]  }
   0xb   :  { %10 = dma.vmem_to_smem %s8_s11, 16, %s600_s13, [#allocation4] }
   0xc   :  { %580 = dma.done.wait [#allocation4], 16 }
   0xd   :  { %581 = vsyncadd [#allocation4], 4294967280 }
   0xe   :  { %12 = sfence }
   0xf   :  { %13 = vsyncpa [#allocation7], 0 }
  0x10   :  { %15 = vsyncpa [#allocation7 + $0x1], 0  ;;  %s628_s14 = smov 0   ;;  %s630_s15 = smov 0  }
  0x11   :  { %s632_s0 = smov 0  }
  0x12 LB: > { %s278_s16 = sadd.s32 4294967295, %s598_s0   ;;  %s645_s17 = sadd.s32 1, %s598_s0   ;;  %s598_s0 = sphi %s632_s0, %s850_s0   ;;  %s594_s15 = sphi %s630_s15, %s849_s15   ;;  %s590_s14 = sphi %s628_s14, %s848_s14  }
  0x13   : > { %s24_s18 = ssub.s32 %s598_s0, %s645_s17  ;;  %s27_s19 = sadd.s32 1, %s594_s15 }
  0x14   : > { %p25_p5 = scmp.eq.s32.totalorder %s24_s18, 0  ;;  %p279_p6 = scmp.ne.s32.totalorder %s24_s18, 0 }
  0x15   : > { %p31_p7 = scmp.eq.s32.totalorder %s598_s0, 1  ;;  %p36_p8 = scmp.ne.s32.totalorder %s594_s15, %s590_s14 }
  0x16   : > { %s654_s20 = scalar_select %p25_p5, %s594_s15, %s27_s19  }
  0x17   : > { %p656_p9 = por %p279_p6, %p31_p7  ;;  %p37_p10 = scmp.eq.s32.totalorder %s278_s16, 1 }
  0x18   : > { %p280_p12 = scmp.ge.s32.totalorder %s598_s0, 2 }
  0x19   : > { %p660_p11 = por %p37_p10, %p36_p8  ;;  %s51_s23 = sand.u32 (!%p280_p12), 1, %s594_s15  }
  0x1a   : > { %46 = sbr.rel (%p280_p12) target bundleno = 233 (0xe9), region = 12  ;;  %s667_s24 = sshll.u32 (!%p280_p12), %s598_s0, 3 }
  0x1b   : > { %s671_s25 = sshll.u32 (!%p280_p12), %s51_s23, 3  ;;  %s55_s26 = sld [smem:[#allocation5 + %s667_s24]] (!%p280_p12) }
  0x1c   : > { %s601_s27 = smov (!%p280_p12), [#allocation2]   ;;  %s69_s29 = sadd.s32 (!%p280_p12), 1, %s667_s24 }
  0x1d   : > { %s65_s28 = sshll.u32 (!%p280_p12), %s601_s27, 4  ;;  %s677_s30 = sld [smem:[#allocation5 + %s69_s29]] (!%p280_p12)  ;;  %s675_s28 = int_to_ptr.vmem [resolvable:$true] %s65_s28 }
  0x1e   : > { %s85_s3 = sadd.s32 (!%p280_p12), 2, %s667_s24  ;;  %s602_s4 = smov (!%p280_p12), [#allocation2 + $0x1]  }
  0x1f   : > { %s81_s5 = sshll.u32 (!%p280_p12), %s602_s4, 4  ;;  %s680_s6 = sld [smem:[#allocation5 + %s85_s3]] (!%p280_p12)  ;;  %s682_s5 = int_to_ptr.vmem [resolvable:$true] %s81_s5 }
  0x20   : > { %s690_s16 = scalar_lea.hbm (!%p280_p12), %s844_s1, 16000 }
  0x21   : > { %s283_s7 = sshll.u32 %s55_s26, 4 }
  0x22   : > { %s57_s10 = scalar_lea.hbm %s844_s1, %s283_s7 }
  0x23   : > { %s348_s11 = scalar_lea.hbm %s57_s10, 16  ;;  %p351_p0 = scmp.lt.u32.totalorder %s57_s10, %s844_s1 }
  0x24   : > { %p349_p13 = scmp.ne.s32.totalorder %s57_s10, %s348_s11  ;;  %p352_p1 = scmp.lt.u32.totalorder %s690_s16, %s348_s11 }
  0x25   : > { %p354_p3 = scmp.lt.u32.totalorder %s348_s11, %s57_s10 }
  0x26   : > { %p353_p2 = por %p352_p1, %p351_p0 }
  0x28   : > { %p355_p4 = por %p354_p3, %p353_p2 }
  0x2a   : > { %p356_p5 = pnand %p355_p4, %p349_p13 }
  0x2c   : > { %359 = shalt.err (!%p356_p5)  }
  0x2d   : > { %s360_s26 = scalar_lea.vmem %s675_s28, 16  ;;  %s699_s27 = scalar_lea.vmem %s675_s28, 128 }
  0x2e   : > { %p361_p6 = scmp.ne.s32.totalorder %s675_s28, %s360_s26  ;;  %p365_p7 = scmp.lt.s32.totalorder %s675_s28, %s675_s28 }
  0x2f   : > { %p366_p8 = scmp.lt.s32.totalorder %s699_s27, %s360_s26 }
  0x31   : > { %p367_p10 = por %p366_p8, %p365_p7 }
  0x33   : > { %p368_p12 = pnand %p367_p10, %p361_p6 }
  0x35   : > { %371 = shalt.err (!%p368_p12)  }
  0x36   : > { %68 = dma.hbm_to_vmem [thread:$0]  %s57_s10, 16, %s675_s28, [#allocation3] }
  0x37   : > { %s284_s29 = sshll.u32 %s677_s30, 4  ;;  %s603_s3 = smov [#allocation2 + $0x2]  }
  0x38   : > { %s97_s4 = sshll.u32 %s603_s3, 4  ;;  %s72_s9 = scalar_lea.hbm %s844_s1, %s284_s29  ;;  %s709_s4 = int_to_ptr.vmem [resolvable:$true] %s97_s4 }
  0x39   : > { %s372_s11 = scalar_lea.hbm %s72_s9, 16  ;;  %p375_p0 = scmp.lt.u32.totalorder %s72_s9, %s844_s1 }
  0x3a   : > { %p373_p13 = scmp.ne.s32.totalorder %s72_s9, %s372_s11  ;;  %p376_p1 = scmp.lt.u32.totalorder %s690_s16, %s372_s11 }
  0x3b   : > { %p378_p3 = scmp.lt.u32.totalorder %s372_s11, %s72_s9 }
  0x3c   : > { %p377_p2 = por %p376_p1, %p375_p0 }
  0x3e   : > { %p379_p4 = por %p378_p3, %p377_p2 }
  0x40   : > { %p380_p5 = pnand %p379_p4, %p373_p13 }
  0x42   : > { %383 = shalt.err (!%p380_p5)  }
  0x43   : > { %s384_s30 = scalar_lea.vmem %s682_s5, 16  ;;  %p389_p7 = scmp.lt.s32.totalorder %s682_s5, %s675_s28 }
  0x44   : > { %p385_p6 = scmp.ne.s32.totalorder %s682_s5, %s384_s30  ;;  %p390_p8 = scmp.lt.s32.totalorder %s699_s27, %s384_s30 }
  0x46   : > { %p391_p10 = por %p390_p8, %p389_p7 }
  0x48   : > { %p392_p12 = pnand %p391_p10, %p385_p6 }
  0x4a   : > { %395 = shalt.err (!%p392_p12)  }
  0x4b   : > { %84 = dma.hbm_to_vmem [thread:$0]  %s72_s9, 16, %s682_s5, [#allocation3] }
  0x4c   : > { %s285_s10 = sshll.u32 %s680_s6, 4  ;;  %s101_s18 = sadd.s32 3, %s667_s24 }
  0x4d   : > { %s88_s29 = scalar_lea.hbm %s844_s1, %s285_s10  ;;  %s726_s3 = sld [smem:[#allocation5 + %s101_s18]] }
  0x4e   : > { %s396_s7 = scalar_lea.hbm %s88_s29, 16  ;;  %p399_p0 = scmp.lt.u32.totalorder %s88_s29, %s844_s1 }
  0x4f   : > { %p397_p13 = scmp.ne.s32.totalorder %s88_s29, %s396_s7  ;;  %p400_p1 = scmp.lt.u32.totalorder %s690_s16, %s396_s7 }
  0x50   : > { %p402_p3 = scmp.lt.u32.totalorder %s396_s7, %s88_s29 }
  0x51   : > { %p401_p2 = por %p400_p1, %p399_p0 }
  0x53   : > { %p403_p4 = por %p402_p3, %p401_p2 }
  0x55   : > { %p404_p5 = pnand %p403_p4, %p397_p13 }
  0x57   : > { %407 = shalt.err (!%p404_p5)  }
  0x58   : > { %s408_s5 = scalar_lea.vmem %s709_s4, 16  ;;  %p413_p7 = scmp.lt.s32.totalorder %s709_s4, %s675_s28 }
  0x59   : > { %p409_p6 = scmp.ne.s32.totalorder %s709_s4, %s408_s5  ;;  %p414_p8 = scmp.lt.s32.totalorder %s699_s27, %s408_s5 }
  0x5b   : > { %p415_p10 = por %p414_p8, %p413_p7 }
  0x5d   : > { %p416_p12 = pnand %p415_p10, %p409_p6 }
  0x5f   : > { %419 = shalt.err (!%p416_p12)  }
  0x60   : > { %100 = dma.hbm_to_vmem [thread:$0]  %s88_s29, 16, %s709_s4, [#allocation3] }
  0x61   : > { %s117_s6 = sadd.s32 4, %s667_s24  ;;  %s604_s9 = smov [#allocation2 + $0x3]  }
  0x62   : > { %s113_s12 = sshll.u32 %s604_s9, 4  ;;  %s118_s13 = sld [smem:[#allocation5 + %s117_s6]]  ;;  %s114_s12 = int_to_ptr.vmem [resolvable:$true] %s113_s12 }
  0x63   : > { %s605_s30 = smov [#allocation2 + $0x4]   ;;  %s133_s18 = sadd.s32 5, %s667_s24 }
  0x64   : > { %s129_s10 = sshll.u32 %s605_s30, 4  ;;  %s286_s19 = sshll.u32 %s726_s3, 4  ;;  %s741_s10 = int_to_ptr.vmem [resolvable:$true] %s129_s10 }
  0x65   : > { %s104_s8 = scalar_lea.hbm %s844_s1, %s286_s19  ;;  %s746_s11 = sld [smem:[#allocation5 + %s133_s18]] }
  0x66   : > { %s420_s5 = scalar_lea.hbm %s104_s8, 16  ;;  %p423_p0 = scmp.lt.u32.totalorder %s104_s8, %s844_s1 }
  0x67   : > { %p421_p13 = scmp.ne.s32.totalorder %s104_s8, %s420_s5  ;;  %p424_p1 = scmp.lt.u32.totalorder %s690_s16, %s420_s5 }
  0x68   : > { %p426_p3 = scmp.lt.u32.totalorder %s420_s5, %s104_s8 }
  0x69   : > { %p425_p2 = por %p424_p1, %p423_p0 }
  0x6b   : > { %p427_p4 = por %p426_p3, %p425_p2 }
  0x6d   : > { %p428_p5 = pnand %p427_p4, %p421_p13 }
  0x6f   : > { %431 = shalt.err (!%p428_p5)  }
  0x70   : > { %s432_s3 = scalar_lea.vmem %s114_s12, 16  ;;  %p437_p7 = scmp.lt.s32.totalorder %s114_s12, %s675_s28 }
  0x71   : > { %p433_p6 = scmp.ne.s32.totalorder %s114_s12, %s432_s3  ;;  %p438_p8 = scmp.lt.s32.totalorder %s699_s27, %s432_s3 }
  0x73   : > { %p439_p10 = por %p438_p8, %p437_p7 }
  0x75   : > { %p440_p12 = pnand %p439_p10, %p433_p6 }
  0x77   : > { %443 = shalt.err (!%p440_p12)  }
  0x78   : > { %116 = dma.hbm_to_vmem [thread:$0]  %s104_s8, 16, %s114_s12, [#allocation3] }
  0x79   : > { %s287_s6 = sshll.u32 %s118_s13, 4  ;;  %s606_s19 = smov [#allocation2 + $0x5]  }
  0x7a   : > { %s120_s18 = scalar_lea.hbm %s844_s1, %s287_s6  ;;  %s145_s26 = sshll.u32 %s606_s19, 4  ;;  %s146_s26 = int_to_ptr.vmem [resolvable:$true] %s145_s26 }
  0x7b   : > { %s444_s7 = scalar_lea.hbm %s120_s18, 16  ;;  %p447_p0 = scmp.lt.u32.totalorder %s120_s18, %s844_s1 }
  0x7c   : > { %p445_p13 = scmp.ne.s32.totalorder %s120_s18, %s444_s7  ;;  %p448_p1 = scmp.lt.u32.totalorder %s690_s16, %s444_s7 }
  0x7d   : > { %p450_p3 = scmp.lt.u32.totalorder %s444_s7, %s120_s18 }
  0x7e   : > { %p449_p2 = por %p448_p1, %p447_p0 }
  0x80   : > { %p451_p4 = por %p450_p3, %p449_p2 }
  0x82   : > { %p452_p5 = pnand %p451_p4, %p445_p13 }
  0x84   : > { %455 = shalt.err (!%p452_p5)  }
  0x85   : > { %s456_s12 = scalar_lea.vmem %s741_s10, 16  ;;  %p461_p7 = scmp.lt.s32.totalorder %s741_s10, %s675_s28 }
  0x86   : > { %p457_p6 = scmp.ne.s32.totalorder %s741_s10, %s456_s12  ;;  %p462_p8 = scmp.lt.s32.totalorder %s699_s27, %s456_s12 }
  0x88   : > { %p463_p10 = por %p462_p8, %p461_p7 }
  0x8a   : > { %p464_p12 = pnand %p463_p10, %p457_p6 }
  0x8c   : > { %467 = shalt.err (!%p464_p12)  }
  0x8d   : > { %132 = dma.hbm_to_vmem [thread:$0]  %s120_s18, 16, %s741_s10, [#allocation3] }
  0x8e   : > { %s149_s13 = sadd.s32 6, %s667_s24  ;;  %s288_s8 = sshll.u32 %s746_s11, 4 }
  0x8f   : > { %s150_s29 = sld [smem:[#allocation5 + %s149_s13]]  ;;  %s136_s9 = scalar_lea.hbm %s844_s1, %s288_s8 }
  0x90   : > { %s468_s30 = scalar_lea.hbm %s136_s9, 16  ;;  %p471_p0 = scmp.lt.u32.totalorder %s136_s9, %s844_s1 }
  0x91   : > { %p469_p13 = scmp.ne.s32.totalorder %s136_s9, %s468_s30  ;;  %p472_p1 = scmp.lt.u32.totalorder %s690_s16, %s468_s30 }
  0x92   : > { %p474_p3 = scmp.lt.u32.totalorder %s468_s30, %s136_s9 }
  0x93   : > { %p473_p2 = por %p472_p1, %p471_p0 }
  0x95   : > { %p475_p4 = por %p474_p3, %p473_p2 }
  0x97   : > { %p476_p5 = pnand %p475_p4, %p469_p13 }
  0x99   : > { %479 = shalt.err (!%p476_p5)  }
  0x9a   : > { %s480_s10 = scalar_lea.vmem %s146_s26, 16  ;;  %p485_p7 = scmp.lt.s32.totalorder %s146_s26, %s675_s28 }
  0x9b   : > { %p481_p6 = scmp.ne.s32.totalorder %s146_s26, %s480_s10  ;;  %p486_p8 = scmp.lt.s32.totalorder %s699_s27, %s480_s10 }
  0x9d   : > { %p487_p10 = por %p486_p8, %p485_p7 }
  0x9f   : > { %p488_p12 = pnand %p487_p10, %p481_p6 }
  0xa1   : > { %491 = shalt.err (!%p488_p12)  }
  0xa2   : > { %148 = dma.hbm_to_vmem [thread:$0]  %s136_s9, 16, %s146_s26, [#allocation3] }
  0xa3   : > { %s607_s11 = smov [#allocation2 + $0x6]   ;;  %s165_s5 = sadd.s32 7, %s667_s24 }
  0xa4   : > { %s161_s18 = sshll.u32 %s607_s11, 4  ;;  %s166_s4 = sld [smem:[#allocation5 + %s165_s5]]  ;;  %s162_s18 = int_to_ptr.vmem [resolvable:$true] %s161_s18 }
  0xa5   : > { %s289_s12 = sshll.u32 %s150_s29, 4  ;;  %s608_s13 = smov [#allocation2 + $0x7]  }
  0xa6   : > { %s177_s8 = sshll.u32 %s608_s13, 4  ;;  %s152_s30 = scalar_lea.hbm %s844_s1, %s289_s12  ;;  %s178_s8 = int_to_ptr.vmem [resolvable:$true] %s177_s8 }
  0xa7   : > { %s492_s19 = scalar_lea.hbm %s152_s30, 16  ;;  %p495_p0 = scmp.lt.u32.totalorder %s152_s30, %s844_s1 }
  0xa8   : > { %p493_p13 = scmp.ne.s32.totalorder %s152_s30, %s492_s19  ;;  %p496_p1 = scmp.lt.u32.totalorder %s690_s16, %s492_s19 }
  0xa9   : > { %p498_p3 = scmp.lt.u32.totalorder %s492_s19, %s152_s30 }
  0xaa   : > { %p497_p2 = por %p496_p1, %p495_p0 }
  0xac   : > { %p499_p4 = por %p498_p3, %p497_p2 }
  0xae   : > { %p500_p5 = pnand %p499_p4, %p493_p13 }
  0xb0   : > { %503 = shalt.err (!%p500_p5)  }
  0xb1   : > { %s504_s24 = scalar_lea.vmem %s162_s18, 16  ;;  %p509_p7 = scmp.lt.s32.totalorder %s162_s18, %s675_s28 }
  0xb2   : > { %p505_p6 = scmp.ne.s32.totalorder %s162_s18, %s504_s24  ;;  %p510_p8 = scmp.lt.s32.totalorder %s699_s27, %s504_s24 }
  0xb4   : > { %p511_p10 = por %p510_p8, %p509_p7 }
  0xb6   : > { %p512_p12 = pnand %p511_p10, %p505_p6 }
  0xb8   : > { %515 = shalt.err (!%p512_p12)  }
  0xb9   : > { %164 = dma.hbm_to_vmem [thread:$0]  %s152_s30, 16, %s162_s18, [#allocation3] }
  0xba   : > { %s290_s26 = sshll.u32 %s166_s4, 4 }
  0xbb   : > { %s168_s11 = scalar_lea.hbm %s844_s1, %s290_s26 }
  0xbc   : > { %s516_s5 = scalar_lea.hbm %s168_s11, 16  ;;  %p519_p0 = scmp.lt.u32.totalorder %s168_s11, %s844_s1 }
  0xbd   : > { %p517_p13 = scmp.ne.s32.totalorder %s168_s11, %s516_s5  ;;  %p520_p1 = scmp.lt.u32.totalorder %s690_s16, %s516_s5 }
  0xbe   : > { %p522_p3 = scmp.lt.u32.totalorder %s516_s5, %s168_s11 }
  0xbf   : > { %p521_p2 = por %p520_p1, %p519_p0 }
  0xc1   : > { %p523_p4 = por %p522_p3, %p521_p2 }
  0xc3   : > { %p524_p5 = pnand %p523_p4, %p517_p13 }
  0xc5   : > { %527 = shalt.err (!%p524_p5)  }
  0xc6   : > { %s528_s18 = scalar_lea.vmem %s178_s8, 16  ;;  %p533_p7 = scmp.lt.s32.totalorder %s178_s8, %s675_s28 }
  0xc7   : > { %p529_p6 = scmp.ne.s32.totalorder %s178_s8, %s528_s18  ;;  %p534_p8 = scmp.lt.s32.totalorder %s699_s27, %s528_s18 }
  0xc9   : > { %p535_p10 = por %p534_p8, %p533_p7 }
  0xcb   : > { %p536_p12 = pnand %p535_p10, %p529_p6 }
  0xcd   : > { %539 = shalt.err (!%p536_p12)  }
  0xce   : > { %180 = dma.hbm_to_vmem [thread:$0]  %s168_s11, 16, %s178_s8, [#allocation3] }
  0xcf   : > { %s53_s4 = scalar_lea.vmem [#allocation6], %s671_s25 }
  0xd0   : > { %582 = dma.done.wait [#allocation3], 128 }
  0xd1   : > { %583 = vsyncadd [#allocation3], 4294967168  ;;  %s292_s16 = sshll.u32 %s598_s0, 7  ;;  %s213_s3 = sshll.u32 %s53_s4, 4  ;;  %v197_v0 = vld [vmem:[#allocation2] sm:$0xff]  ;;  %s804_s3 = int_to_ptr.vmem [resolvable:$true] %s213_s3 }
  0xd2   : > { %s802_s19 = scalar_lea.hbm %s845_s2, %s292_s16  ;;  %198 = vst [vmem:[%s53_s4] sm:$0xff] %v197_v0  ;;  %s200_s25 = scalar_lea.sflag [#allocation7], %s51_s23 }
  0xd3   : > { %s540_s28 = scalar_lea.vmem %s804_s3, 128  ;;  %s609_s27 = smov [#allocation6]  }
  0xd4   : > { %p541_p13 = scmp.ne.s32.totalorder %s804_s3, %s540_s28  ;;  %s544_s8 = sshll.u32 %s609_s27, 4  ;;  %s545_s8 = int_to_ptr.vmem [resolvable:$false] %s544_s8 }
  0xd5   : > { %s546_s7 = scalar_lea.vmem %s545_s8, 256  ;;  %p547_p2 = scmp.lt.s32.totalorder %s804_s3, %s545_s8 }
  0xd6   : > { %p542_p0 = pnand %p541_p13, %p656_p9  ;;  %p548_p3 = scmp.lt.s32.totalorder %s546_s7, %s540_s28 }
  0xd8   : > { %p543_p1 = pneg %p542_p0  ;;  %p549_p4 = por %p548_p3, %p547_p2 }
  0xda   : > { %p550_p5 = pnand %p549_p4, %p543_p1 }
  0xdc   : > { %553 = shalt.err (!%p550_p5)
}
  0xdd   : > { %s554_s23 = scalar_lea.hbm %s802_s19, 128  ;;  %s558_s26 = scalar_lea.hbm %s845_s2, 256 }
  0xde   : > { %p555_p6 = scmp.ne.s32.totalorder %s802_s19, %s554_s23  ;;  %p559_p10 = scmp.lt.u32.totalorder %s802_s19, %s845_s2 }
  0xdf   : > { %p560_p12 = scmp.lt.u32.totalorder %s558_s26, %s554_s23  ;;  %p562_p0 = scmp.lt.u32.totalorder %s554_s23, %s802_s19 }
  0xe0   : > { %p556_p7 = pnand %p555_p6, %p656_p9 }
  0xe1   : > { %p561_p13 = por %p560_p12, %p559_p10 }
  0xe2   : > { %p557_p8 = pneg %p556_p7 }
  0xe3   : > { %p563_p1 = por %p562_p0, %p561_p13 }
  0xe5   : > { %p564_p2 = pnand %p563_p1, %p557_p8 }
  0xe7   : > { %567 = shalt.err (!%p564_p2)
}
  0xe8   : > { %296 = dma.vmem_to_hbm [thread:$0]  (%p656_p9), %s804_s3, 128, %s802_s19, %s200_s25  }
  0xe9 PF: > { %p302_p3 = scmp.ge.s32.totalorder %s598_s0, 1  ;;  %s225_s11 = sand.u32 1, %s590_s14  }
  0xea   : > { %s226_s5 = scalar_lea.sflag [#allocation7], %s225_s11 }
  0xeb   : > { %p299_p4 = pnand %p302_p3, %p660_p11 }
  0xed   : > { %585 = dma.done.wait (!%p299_p4), %s226_s5, 128  }
  0xee   : > { %587 = vsyncadd (!%p299_p4), %s226_s5, 4294967168  ;;  %p18_p5 = scmp.ge.s32.totalorder %s645_s17, 3   ;;  %s848_s14 = smov %s594_s15 }
  0xef   : > { %s849_s15 = smov %s654_s20  ;;  %s850_s0 = smov %s645_s17 }
  0xf0   :  { %20 = sbr.rel (!%p18_p5) target bundleno = 18 (0x12), region = 91 }
  0xf7   :  { %231 = vsyncpa [#allocation7], 1 }
  0xf8   :  { %233 = vsyncpa [#allocation7 + $0x1], 1 }
  0xf9   :  { %234 = vsyncmov [#allocation3] }
  0xfc   :  { %s235_s0 = vpop.sfrf %234 }
  0xfd   :  { %p295_p9 = scmp.ne.s32.totalorder %s235_s0, 0 }
  0xff   :  { %239 = shalt.err (%p295_p9)  }

</bundles_post_ra>
